<compile_context>
chip_gen: v7x
topology: tpu7x:2x2x1
jax: 0.10.0
libtpu: 0.0.40
codegen_flags: <defaults>
</compile_context>

<pallas_src>
import functools

import jax
import jax.numpy as jnp
from jax.experimental import pallas as pl
from jax.experimental.pallas import tpu as pltpu

LANE = 128   # lane tile (last dim)
SUBLANE = 8  # sublane tile (second-to-last dim, f32)


def _round_up(n, m):
    return ((n + m - 1) // m) * m


def _pad2d(a, rows, cols):
    return jnp.pad(a, ((0, rows - a.shape[0]), (0, cols - a.shape[1])))


def vae_kernel(
    x_ref, eps_ref,
    w1e_ref, b1e_ref,    # encoder fc1                 [ip, hp]    / [1, hp]
    wml_ref, bml_ref,    # fused fc2_mu | fc2_log_var  [hp, 2*lp]  / [1, 2*lp]
    w1d_ref, b1d_ref,    # decoder fc1                 [lp, hp]    / [1, hp]
    w2d_ref, b2d_ref,    # decoder fc2                 [hp, ip]    / [1, ip]
    xrec_ref, mulv_ref, z_ref,
):
    lp = z_ref.shape[-1]

    # ---- Encoder ----
    x = x_ref[...].astype(jnp.bfloat16)
    h = jnp.dot(x, w1e_ref[...], preferred_element_type=jnp.float32) + b1e_ref[...]
    h = jnp.maximum(h, 0.0)  # ReLU in f32

    # mu and log_var computed with a single fused MXU matmul.
    mulv = (jnp.dot(h.astype(jnp.bfloat16), wml_ref[...],
                    preferred_element_type=jnp.float32) + bml_ref[...])
    mu = mulv[:, :lp]          # lane-aligned slice (lp is a multiple of 128)
    log_var = mulv[:, lp:]

    # ---- Reparameterize: z = mu + eps * exp(0.5 * log_var) ----
    z = mu + eps_ref[...] * jnp.exp(0.5 * log_var)   # exp -> EUP slot

    # ---- Decoder ----
    hd = (jnp.dot(z.astype(jnp.bfloat16), w1d_ref[...],
                  preferred_element_type=jnp.float32) + b1d_ref[...])
    hd = jnp.maximum(hd, 0.0)
    xrec = (jnp.dot(hd.astype(jnp.bfloat16), w2d_ref[...],
                    preferred_element_type=jnp.float32) + b2d_ref[...])

    # Lane-dense f32 stores (all last dims are multiples of 128).
    xrec_ref[...] = xrec
    mulv_ref[...] = mulv
    z_ref[...] = z


@functools.partial(jax.jit, static_argnames=("batch_tile",))
def vae_forward(x, eps, params, *, batch_tile=512):
    """Full VAE forward in one batch-tiled Pallas call.

    x:      [B, input_dim]  float32
    eps:    [B, latent_dim] float32 (the randn_like noise for reparameterize)
    params: dict of weights ([in, out]) and biases ([1, out]), unpadded f32.
    Returns (x_reconstructed, mu, log_var, z) at the original (unpadded) shapes.
    """
    B, input_dim = x.shape
    hidden_dim = params["w1e"].shape[1]
    latent_dim = params["wmu"].shape[1]

    ip = _round_up(input_dim, LANE)
    hp = _round_up(hidden_dim, LANE)
    lp = _round_up(latent_dim, LANE)

    # Batch tile: multiple of 8 sublanes; default 512 rows keeps double-buffered
    # activation tiles + resident weights far under v7x's 64 MiB VMEM.
    tb = min(_round_up(B, SUBLANE), _round_up(batch_tile, SUBLANE))
    Bp = _round_up(_round_up(B, SUBLANE), tb)
    grid = (Bp // tb,)

    # Zero-pad activations to (sublane, lane) tiles.
    x_p = _pad2d(x, Bp, ip)
    eps_p = _pad2d(eps, Bp, lp)

    f32, bf16 = jnp.float32, jnp.bfloat16
    # Weights zero-padded to tile boundaries and stored bf16 for the MXU;
    # biases stay f32 (bias add / ReLU / exp run in f32).
    w1e = _pad2d(params["w1e"], ip, hp).astype(bf16)
    b1e = _pad2d(params["b1e"], 1, hp).astype(f32)
    wml = jnp.concatenate(
        [_pad2d(params["wmu"], hp, lp), _pad2d(params["wlv"], hp, lp)], axis=1
    ).astype(bf16)
    bml = jnp.concatenate(
        [_pad2d(params["bmu"], 1, lp), _pad2d(params["blv"], 1, lp)], axis=1
    ).astype(f32)
    w1d = _pad2d(params["w1d"], lp, hp).astype(bf16)
    b1d = _pad2d(params["b1d"], 1, hp).astype(f32)
    w2d = _pad2d(params["w2d"], hp, ip).astype(bf16)
    b2d = _pad2d(params["b2d"], 1, ip).astype(f32)

    def tile(d):          # batch-tiled array, streamed through the pipeline
        return pl.BlockSpec((tb, d), lambda i: (i, 0))

    def resident(shape):  # weights/biases: same block every step -> DMA'd once
        return pl.BlockSpec(shape, lambda i: (0, 0))

    in_specs = [
        tile(ip), tile(lp),
        resident((ip, hp)), resident((1, hp)),
        resident((hp, 2 * lp)), resident((1, 2 * lp)),
        resident((lp, hp)), resident((1, hp)),
        resident((hp, ip)), resident((1, ip)),
    ]
    out_specs = [tile(ip), tile(2 * lp), tile(lp)]
    out_shapes = (
        jax.ShapeDtypeStruct((Bp, ip), f32),       # x_reconstructed (padded)
        jax.ShapeDtypeStruct((Bp, 2 * lp), f32),   # [mu | log_var]  (padded)
        jax.ShapeDtypeStruct((Bp, lp), f32),       # z               (padded)
    )

    xrec_p, mulv_p, z_p = pl.pallas_call(
        vae_kernel,
        grid=grid,
        in_specs=in_specs,
        out_specs=out_specs,
        out_shape=out_shapes,
        compiler_params=pltpu.CompilerParams(
            dimension_semantics=("parallel",)),
    )(x_p, eps_p, w1e, b1e, wml, bml, w1d, b1d, w2d, b2d)

    # Unpack / unpad (layout plumbing only).
    x_reconstructed = xrec_p[:B, :input_dim]
    mu = mulv_p[:B, :latent_dim]
    log_var = mulv_p[:B, lp:lp + latent_dim]
    z = z_p[:B, :latent_dim]
    return x_reconstructed, mu, log_var, z


def init_linear(key, fan_in, fan_out):
    """Init mimicking torch.nn.Linear (uniform +-1/sqrt(fan_in)); weight as [in, out]."""
    kw, kb = jax.random.split(key)
    bound = 1.0 / jnp.sqrt(float(fan_in))
    w = jax.random.uniform(kw, (fan_in, fan_out), jnp.float32, -bound, bound)
    b = jax.random.uniform(kb, (1, fan_out), jnp.float32, -bound, bound)
    return w, b


def make_params(key, input_dim, hidden_dim, latent_dim):
    k1, k2, k3, k4, k5 = jax.random.split(key, 5)
    w1e, b1e = init_linear(k1, input_dim, hidden_dim)     # encoder.fc1
    wmu, bmu = init_linear(k2, hidden_dim, latent_dim)    # encoder.fc2_mu
    wlv, blv = init_linear(k3, hidden_dim, latent_dim)    # encoder.fc2_log_var
    w1d, b1d = init_linear(k4, latent_dim, hidden_dim)    # decoder.fc1
    w2d, b2d = init_linear(k5, hidden_dim, input_dim)     # decoder.fc2
    return dict(w1e=w1e, b1e=b1e, wmu=wmu, bmu=bmu, wlv=wlv, blv=blv,
                w1d=w1d, b1d=b1d, w2d=w2d, b2d=b2d)


def vae_reference_f32(x, eps, p):
    """Pure-JAX f32 reference matching the PyTorch forward exactly."""
    h = jnp.maximum(x @ p["w1e"] + p["b1e"], 0.0)
    mu = h @ p["wmu"] + p["bmu"]
    lv = h @ p["wlv"] + p["blv"]
    z = mu + eps * jnp.exp(0.5 * lv)
    hd = jnp.maximum(z @ p["w1d"] + p["b1d"], 0.0)
    xr = hd @ p["w2d"] + p["b2d"]
    return xr, mu, lv, z


def vae_reference_bf16(x, eps, p):
    """Reference mirroring the kernel's bf16-input / f32-accumulate matmuls."""
    bf = jnp.bfloat16
    dot = lambda a, b: jnp.dot(a.astype(bf), b.astype(bf),
                               preferred_element_type=jnp.float32)
    h = jnp.maximum(dot(x, p["w1e"]) + p["b1e"], 0.0)
    mu = dot(h, p["wmu"]) + p["bmu"]
    lv = dot(h, p["wlv"]) + p["blv"]
    z = mu + eps * jnp.exp(0.5 * lv)
    hd = jnp.maximum(dot(z, p["w1d"]) + p["b1d"], 0.0)
    xr = dot(hd, p["w2d"]) + p["b2d"]
    return xr, mu, lv, z


if __name__ == "__main__":
    # Small shapes consistent with the module: VAE(input_dim, hidden_dim, latent_dim, batch_size)
    batch_size, input_dim, hidden_dim, latent_dim = 2, 16, 32, 8

    key = jax.random.PRNGKey(0)
    kx, keps, kparams = jax.random.split(key, 3)

    x = jax.random.normal(kx, (batch_size, input_dim), jnp.float32)
    # eps is the torch.randn_like(std) noise from reparameterize, generated
    # deterministically outside the kernel so the result is reproducible.
    eps = jax.random.normal(keps, (batch_size, latent_dim), jnp.float32)

    params = make_params(kparams, input_dim, hidden_dim, latent_dim)

    outs = jax.block_until_ready(vae_forward(x, eps, params))
    x_reconstructed, mu, log_var, z = outs

    # (a) Tight check against a reference with identical bf16 matmul numerics.
    for got, want in zip(outs, vae_reference_bf16(x, eps, params)):
        assert got.shape == want.shape and got.dtype == jnp.float32
        assert jnp.allclose(got, want, atol=2e-2, rtol=2e-2), \
            float(jnp.max(jnp.abs(got - want)))

    # (b) Looser check against the pure-f32 PyTorch-equivalent math
    #     (bf16 MXU inputs => relaxed tolerance, as flagged in the review).
    for got, want in zip(outs, vae_reference_f32(x, eps, params)):
        assert jnp.allclose(got, want, atol=5e-2, rtol=5e-2), \
            float(jnp.max(jnp.abs(got - want)))

    print("KERNEL_OK")
</pallas_src>

<mosaic_0001>
module attributes {stable_mosaic.version = 11 : i64} {
  func.func @vae_kernel(%arg0: i32, %arg1: memref<8x128xf32, #tpu.memory_space<vmem>>, %arg2: memref<8x128xf32, #tpu.memory_space<vmem>>, %arg3: memref<128x128xbf16, #tpu.memory_space<vmem>>, %arg4: memref<1x128xf32, #tpu.memory_space<vmem>>, %arg5: memref<128x256xbf16, #tpu.memory_space<vmem>>, %arg6: memref<1x256xf32, #tpu.memory_space<vmem>>, %arg7: memref<128x128xbf16, #tpu.memory_space<vmem>>, %arg8: memref<1x128xf32, #tpu.memory_space<vmem>>, %arg9: memref<128x128xbf16, #tpu.memory_space<vmem>>, %arg10: memref<1x128xf32, #tpu.memory_space<vmem>>, %arg11: memref<8x128xf32, #tpu.memory_space<vmem>>, %arg12: memref<8x256xf32, #tpu.memory_space<vmem>>, %arg13: memref<8x128xf32, #tpu.memory_space<vmem>>) attributes {dimension_semantics = [#tpu.dimension_semantics<parallel>], iteration_bounds = array<i64: 1>, scalar_prefetch = 0 : i64, scratch_operands = 0 : i64, tpu.core_type = #tpu.core_type<tc>, window_params = [{transform_indices = @transform_0, window_bounds = array<i64: 8, 128>}, {transform_indices = @transform_1, window_bounds = array<i64: 8, 128>}, {pipeline_mode = #tpu.pipeline_mode<synchronous>, transform_indices = @transform_2, window_bounds = array<i64: 128, 128>}, {pipeline_mode = #tpu.pipeline_mode<synchronous>, transform_indices = @transform_3, window_bounds = array<i64: 1, 128>}, {pipeline_mode = #tpu.pipeline_mode<synchronous>, transform_indices = @transform_4, window_bounds = array<i64: 128, 256>}, {pipeline_mode = #tpu.pipeline_mode<synchronous>, transform_indices = @transform_5, window_bounds = array<i64: 1, 256>}, {pipeline_mode = #tpu.pipeline_mode<synchronous>, transform_indices = @transform_6, window_bounds = array<i64: 128, 128>}, {pipeline_mode = #tpu.pipeline_mode<synchronous>, transform_indices = @transform_7, window_bounds = array<i64: 1, 128>}, {pipeline_mode = #tpu.pipeline_mode<synchronous>, transform_indices = @transform_8, window_bounds = array<i64: 128, 128>}, {pipeline_mode = #tpu.pipeline_mode<synchronous>, transform_indices = @transform_9, window_bounds = array<i64: 1, 128>}, {transform_indices = @transform_10, window_bounds = array<i64: 8, 128>}, {transform_indices = @transform_11, window_bounds = array<i64: 8, 256>}, {transform_indices = @transform_12, window_bounds = array<i64: 8, 128>}]} {
    %c0 = arith.constant 0 : index
    %c0_0 = arith.constant 0 : index
    %0 = vector.load %arg1[%c0, %c0_0] : memref<8x128xf32, #tpu.memory_space<vmem>>, vector<8x128xf32>
    %1 = arith.truncf %0 : vector<8x128xf32> to vector<8x128xbf16>
    %c0_1 = arith.constant 0 : index
    %c0_2 = arith.constant 0 : index
    %2 = vector.load %arg3[%c0_1, %c0_2] : memref<128x128xbf16, #tpu.memory_space<vmem>>, vector<128x128xbf16>
    %cst = arith.constant dense<0.000000e+00> : vector<8x128xf32>
    %3 = tpu.matmul %1, %2, %cst {dimension_numbers = #tpu.dot_dimension_numbers<[1], [0], [0], [1], [0, 0, 1, 1], [], []>} : vector<8x128xbf16>, vector<128x128xbf16>, vector<8x128xf32> -> vector<8x128xf32>
    %c0_3 = arith.constant 0 : index
    %c0_4 = arith.constant 0 : index
    %4 = vector.load %arg4[%c0_3, %c0_4] : memref<1x128xf32, #tpu.memory_space<vmem>>, vector<1x128xf32>
    %5 = vector.broadcast %4 : vector<1x128xf32> to vector<8x128xf32>
    %6 = arith.addf %3, %5 : vector<8x128xf32>
    %cst_5 = arith.constant 0.000000e+00 : f32
    %7 = vector.broadcast %cst_5 : f32 to vector<8x128xf32>
    %8 = arith.maximumf %6, %7 : vector<8x128xf32>
    %9 = arith.truncf %8 : vector<8x128xf32> to vector<8x128xbf16>
    %c0_6 = arith.constant 0 : index
    %c0_7 = arith.constant 0 : index
    %10 = vector.load %arg5[%c0_6, %c0_7] : memref<128x256xbf16, #tpu.memory_space<vmem>>, vector<128x256xbf16>
    %cst_8 = arith.constant dense<0.000000e+00> : vector<8x256xf32>
    %11 = tpu.matmul %9, %10, %cst_8 {dimension_numbers = #tpu.dot_dimension_numbers<[1], [0], [0], [1], [0, 0, 1, 1], [], []>} : vector<8x128xbf16>, vector<128x256xbf16>, vector<8x256xf32> -> vector<8x256xf32>
    %c0_9 = arith.constant 0 : index
    %c0_10 = arith.constant 0 : index
    %12 = vector.load %arg6[%c0_9, %c0_10] : memref<1x256xf32, #tpu.memory_space<vmem>>, vector<1x256xf32>
    %13 = vector.broadcast %12 : vector<1x256xf32> to vector<8x256xf32>
    %14 = arith.addf %11, %13 : vector<8x256xf32>
    %15 = vector.extract_strided_slice %14 {offsets = [0, 0], sizes = [8, 128], strides = [1, 1]} : vector<8x256xf32> to vector<8x128xf32>
    %16 = vector.extract_strided_slice %14 {offsets = [0, 128], sizes = [8, 128], strides = [1, 1]} : vector<8x256xf32> to vector<8x128xf32>
    %c0_11 = arith.constant 0 : index
    %c0_12 = arith.constant 0 : index
    %17 = vector.load %arg2[%c0_11, %c0_12] : memref<8x128xf32, #tpu.memory_space<vmem>>, vector<8x128xf32>
    %cst_13 = arith.constant 5.000000e-01 : f32
    %18 = vector.broadcast %cst_13 : f32 to vector<8x128xf32>
    %19 = arith.mulf %18, %16 : vector<8x128xf32>
    %20 = math.exp %19 : vector<8x128xf32>
    %21 = arith.mulf %17, %20 : vector<8x128xf32>
    %22 = arith.addf %15, %21 : vector<8x128xf32>
    %23 = arith.truncf %22 : vector<8x128xf32> to vector<8x128xbf16>
    %c0_14 = arith.constant 0 : index
    %c0_15 = arith.constant 0 : index
    %24 = vector.load %arg7[%c0_14, %c0_15] : memref<128x128xbf16, #tpu.memory_space<vmem>>, vector<128x128xbf16>
    %cst_16 = arith.constant dense<0.000000e+00> : vector<8x128xf32>
    %25 = tpu.matmul %23, %24, %cst_16 {dimension_numbers = #tpu.dot_dimension_numbers<[1], [0], [0], [1], [0, 0, 1, 1], [], []>} : vector<8x128xbf16>, vector<128x128xbf16>, vector<8x128xf32> -> vector<8x128xf32>
    %c0_17 = arith.constant 0 : index
    %c0_18 = arith.constant 0 : index
    %26 = vector.load %arg8[%c0_17, %c0_18] : memref<1x128xf32, #tpu.memory_space<vmem>>, vector<1x128xf32>
    %27 = vector.broadcast %26 : vector<1x128xf32> to vector<8x128xf32>
    %28 = arith.addf %25, %27 : vector<8x128xf32>
    %cst_19 = arith.constant 0.000000e+00 : f32
    %29 = vector.broadcast %cst_19 : f32 to vector<8x128xf32>
    %30 = arith.maximumf %28, %29 : vector<8x128xf32>
    %31 = arith.truncf %30 : vector<8x128xf32> to vector<8x128xbf16>
    %c0_20 = arith.constant 0 : index
    %c0_21 = arith.constant 0 : index
    %32 = vector.load %arg9[%c0_20, %c0_21] : memref<128x128xbf16, #tpu.memory_space<vmem>>, vector<128x128xbf16>
    %cst_22 = arith.constant dense<0.000000e+00> : vector<8x128xf32>
    %33 = tpu.matmul %31, %32, %cst_22 {dimension_numbers = #tpu.dot_dimension_numbers<[1], [0], [0], [1], [0, 0, 1, 1], [], []>} : vector<8x128xbf16>, vector<128x128xbf16>, vector<8x128xf32> -> vector<8x128xf32>
    %c0_23 = arith.constant 0 : index
    %c0_24 = arith.constant 0 : index
    %34 = vector.load %arg10[%c0_23, %c0_24] : memref<1x128xf32, #tpu.memory_space<vmem>>, vector<1x128xf32>
    %35 = vector.broadcast %34 : vector<1x128xf32> to vector<8x128xf32>
    %36 = arith.addf %33, %35 : vector<8x128xf32>
    %c0_25 = arith.constant 0 : index
    %c0_26 = arith.constant 0 : index
    %37 = vector.load %arg11[%c0_25, %c0_26] : memref<8x128xf32, #tpu.memory_space<vmem>>, vector<8x128xf32>
    tpu.vector_store %arg11[%c0_25, %c0_26], %36 {strides = array<i32>} : memref<8x128xf32, #tpu.memory_space<vmem>>, vector<8x128xf32>,
    %c0_27 = arith.constant 0 : index
    %c0_28 = arith.constant 0 : index
    %38 = vector.load %arg12[%c0_27, %c0_28] : memref<8x256xf32, #tpu.memory_space<vmem>>, vector<8x256xf32>
    tpu.vector_store %arg12[%c0_27, %c0_28], %14 {strides = array<i32>} : memref<8x256xf32, #tpu.memory_space<vmem>>, vector<8x256xf32>,
    %c0_29 = arith.constant 0 : index
    %c0_30 = arith.constant 0 : index
    %39 = vector.load %arg13[%c0_29, %c0_30] : memref<8x128xf32, #tpu.memory_space<vmem>>, vector<8x128xf32>
    tpu.vector_store %arg13[%c0_29, %c0_30], %22 {strides = array<i32>} : memref<8x128xf32, #tpu.memory_space<vmem>>, vector<8x128xf32>,
    return
  }
  func.func @transform_0(%arg0: i32) -> (i32, i32) {
    %c0_i32 = arith.constant 0 : i32
    %c0_i32_0 = arith.constant 0 : i32
    return %arg0, %c0_i32 : i32, i32
  }
  func.func @transform_1(%arg0: i32) -> (i32, i32) {
    %c0_i32 = arith.constant 0 : i32
    %c0_i32_0 = arith.constant 0 : i32
    return %arg0, %c0_i32 : i32, i32
  }
  func.func @transform_2(%arg0: i32) -> (i32, i32) {
    %c0_i32 = arith.constant 0 : i32
    %c0_i32_0 = arith.constant 0 : i32
    %c0_i32_1 = arith.constant 0 : i32
    return %c0_i32, %c0_i32_0 : i32, i32
  }
  func.func @transform_3(%arg0: i32) -> (i32, i32) {
    %c0_i32 = arith.constant 0 : i32
    %c0_i32_0 = arith.constant 0 : i32
    %c0_i32_1 = arith.constant 0 : i32
    return %c0_i32, %c0_i32_0 : i32, i32
  }
  func.func @transform_4(%arg0: i32) -> (i32, i32) {
    %c0_i32 = arith.constant 0 : i32
    %c0_i32_0 = arith.constant 0 : i32
    %c0_i32_1 = arith.constant 0 : i32
    return %c0_i32, %c0_i32_0 : i32, i32
  }
  func.func @transform_5(%arg0: i32) -> (i32, i32) {
    %c0_i32 = arith.constant 0 : i32
    %c0_i32_0 = arith.constant 0 : i32
    %c0_i32_1 = arith.constant 0 : i32
    return %c0_i32, %c0_i32_0 : i32, i32
  }
  func.func @transform_6(%arg0: i32) -> (i32, i32) {
    %c0_i32 = arith.constant 0 : i32
    %c0_i32_0 = arith.constant 0 : i32
    %c0_i32_1 = arith.constant 0 : i32
    return %c0_i32, %c0_i32_0 : i32, i32
  }
  func.func @transform_7(%arg0: i32) -> (i32, i32) {
    %c0_i32 = arith.constant 0 : i32
    %c0_i32_0 = arith.constant 0 : i32
    %c0_i32_1 = arith.constant 0 : i32
    return %c0_i32, %c0_i32_0 : i32, i32
  }
  func.func @transform_8(%arg0: i32) -> (i32, i32) {
    %c0_i32 = arith.constant 0 : i32
    %c0_i32_0 = arith.constant 0 : i32
    %c0_i32_1 = arith.constant 0 : i32
    return %c0_i32, %c0_i32_0 : i32, i32
  }
  func.func @transform_9(%arg0: i32) -> (i32, i32) {
    %c0_i32 = arith.constant 0 : i32
    %c0_i32_0 = arith.constant 0 : i32
    %c0_i32_1 = arith.constant 0 : i32
    return %c0_i32, %c0_i32_0 : i32, i32
  }
  func.func @transform_10(%arg0: i32) -> (i32, i32) {
    %c0_i32 = arith.constant 0 : i32
    %c0_i32_0 = arith.constant 0 : i32
    return %arg0, %c0_i32 : i32, i32
  }
  func.func @transform_11(%arg0: i32) -> (i32, i32) {
    %c0_i32 = arith.constant 0 : i32
    %c0_i32_0 = arith.constant 0 : i32
    return %arg0, %c0_i32 : i32, i32
  }
  func.func @transform_12(%arg0: i32) -> (i32, i32) {
    %c0_i32 = arith.constant 0 : i32
    %c0_i32_0 = arith.constant 0 : i32
    return %arg0, %c0_i32 : i32, i32
  }
}

</mosaic_0001>

<bundles_post_ra>
// kernel: vae_forward.1
= control target key start
LH: loop header
LB: loop body
LE: loop exit
PB: predicated region body
PF: predicated region fallthrough
CT: control target
= control target key end

     0   :  { %v733_v0 = vmov 0.0   ;;  %vm734_vm0 = vmmov 0   ;;  %v735_v27 = vmov 0   ;;  %v172_v50 = vlaneseq  ;;  %s981_s2 = inlined_call_operand.vmem [shape: bf16[128,128], index: 2, kind: input, shape index: {}]   ;;  %s982_s4 = inlined_call_operand.vmem [shape: bf16[128,256], index: 4, kind: input, shape index: {}]   ;;  %s983_s0 = inlined_call_operand.vmem [shape: f32[8,128], index: 0, kind: input, shape index: {}]   ;;  %s984_s6 = inlined_call_operand.vmem [shape: bf16[128,128], index: 6, kind: input, shape index: {}]   ;;  %s985_s3 = inlined_call_operand.vmem [shape: f32[1,128], index: 3, kind: input, shape index: {}]   ;;  %s986_s8 = inlined_call_operand.vmem [shape: bf16[128,128], index: 8, kind: input, shape index: {}]   ;;  %s987_s5 = inlined_call_operand.vmem [shape: f32[1,256], index: 5, kind: input, shape index: {}]   ;;  %s988_s11 = inlined_call_operand.vmem [shape: f32[8,256], index: 11, kind: output, shape index: {1}]   ;;  %s989_s1 = inlined_call_operand.vmem [shape: f32[8,128], index: 1, kind: input, shape index: {}]   ;;  %s990_s12 = inlined_call_operand.vmem [shape: f32[8,128], index: 12, kind: output, shape index: {2}]   ;;  %s991_s7 = inlined_call_operand.vmem [shape: f32[1,128], index: 7, kind: input, shape index: {}]   ;;  %s992_s9 = inlined_call_operand.vmem [shape: f32[1,128], index: 9, kind: input, shape index: {}]   ;;  %s993_s10 = inlined_call_operand.vmem [shape: f32[8,128], index: 10, kind: output, shape index: {0}]  }
   0x1   :  { %620 = vmatprep.subr.bf16.mxu0 %v733_v0  ;;  %v683_v1 = vld [vmem:[%s981_s2] sm:$0xff]   ;;  %636 = vmatprep.mubr.msk.bf16.mxu0 %vm734_vm0, %v733_v0  ;;  %v684_v2 = vld [vmem:[%s981_s2 + $0x8] sm:$0xff]   ;;  %v685_v3 = vld [vmem:[%s981_s2 + $0x10] sm:$0xff]  }
   0x2   :  { %621 = vmatpush3.bf16.msra.mxu0 %v683_v1  ;;  %v691_v4 = vld [vmem:[%s982_s4 + $0x4] ss:$8 sps:$4 sm:$0xff]   ;;  %v693_v5 = vld [vmem:[%s982_s4] ss:$8 sps:$4 sm:$0xff]   ;;  %v686_v6 = vld [vmem:[%s981_s2 + $0x18] sm:$0xff]   ;;  %294 = vmatprep.mubr.bf16.mxu1 %v735_v27  ;;  %v173_v51 = vshrl.u32 %v172_v50, 7 }
   0x3   :  { %622 = vmatprep.subr.bf16.mxu0 %v733_v0  ;;  %v694_v7 = vld [vmem:[%s982_s4 + $0x14] ss:$8 sps:$4 sm:$0xff]   ;;  %262 = vmatprep.subr.bf16.mxu1 %v691_v4  ;;  %v696_v8 = vld [vmem:[%s982_s4 + $0x10] ss:$8 sps:$4 sm:$0xff]   ;;  %v697_v9 = vld [vmem:[%s982_s4 + $0x24] ss:$8 sps:$4 sm:$0xff]  }
   0x4   :  { %263 = vmatpush1.bf16.msra.mxu1 %v693_v5  ;;  %v687_v10 = vld [vmem:[%s981_s2 + $0x20] sm:$0xff]   ;;  %v700_v12 = vld [vmem:[%s982_s4 + $0x34] ss:$8 sps:$4 sm:$0xff]   ;;  %v688_v13 = vld [vmem:[%s981_s2 + $0x28] sm:$0xff]   ;;  %v174_v52 = vsub.s32 0, %v173_v51  ;;  %v178_v54 = vsub.s32 1, %v173_v51 }
   0x5   :  { %264 = vmatprep.subr.bf16.mxu1 %v694_v7  ;;  %v699_v11 = vld [vmem:[%s982_s4 + $0x20] ss:$8 sps:$4 sm:$0xff]   ;;  %v702_v14 = vld [vmem:[%s982_s4 + $0x30] ss:$8 sps:$4 sm:$0xff]   ;;  %v703_v15 = vld [vmem:[%s982_s4 + $0x44] ss:$8 sps:$4 sm:$0xff]  }
   0x6   :  { %623 = vmatpush3.bf16.msra.mxu0 %v684_v2  ;;  %v689_v16 = vld [vmem:[%s981_s2 + $0x30] sm:$0xff]   ;;  %v705_v17 = vld [vmem:[%s982_s4 + $0x40] ss:$8 sps:$4 sm:$0xff]   ;;  %v690_v19 = vld [vmem:[%s981_s2 + $0x38] sm:$0xff]  }
   0x7   :  { %624 = vmatprep.subr.bf16.mxu0 %v733_v0  ;;  %v706_v18 = vld [vmem:[%s982_s4 + $0x54] ss:$8 sps:$4 sm:$0xff]   ;;  %v39_v20 = vld [vmem:[%s983_s0] sm:$0xff]  ;;  %v708_v21 = vld [vmem:[%s982_s4 + $0x50] ss:$8 sps:$4 sm:$0xff]  }
   0x8   :  { %265 = vmatpush1.bf16.msra.mxu1 %v696_v8  ;;  %v40_v22 = vpack.c.bf16 %v39_v20, %v39_v20  ;;  %v709_v23 = vld [vmem:[%s982_s4 + $0x64] ss:$8 sps:$4 sm:$0xff]   ;;  %v711_v24 = vld [vmem:[%s982_s4 + $0x60] ss:$8 sps:$4 sm:$0xff]   ;;  %v712_v25 = vld [vmem:[%s982_s4 + $0x74] ss:$8 sps:$4 sm:$0xff]  }
   0x9   :  { %266 = vmatprep.subr.bf16.mxu1 %v697_v9  ;;  %v714_v26 = vld [vmem:[%s982_s4 + $0x70] ss:$8 sps:$4 sm:$0xff]   ;;  %v715_v28 = vld [vmem:[%s984_s6] sm:$0xff]   ;;  %v716_v29 = vld [vmem:[%s984_s6 + $0x8] sm:$0xff]  }
   0xa   :  { %625 = vmatpush3.bf16.msra.mxu0 %v685_v3  ;;  %v550_v30 = vld [vmem:[%s985_s3] ss:$0 sm:$0xff]  ;;  %v717_v38 = vld [vmem:[%s984_s6 + $0x10] sm:$0xff]   ;;  %v718_v39 = vld [vmem:[%s984_s6 + $0x18] sm:$0xff]  }
   0xb   :  { %626 = vmatprep.subr.bf16.mxu0 %v733_v0  ;;  %v719_v40 = vld [vmem:[%s984_s6 + $0x20] sm:$0xff]   ;;  %v720_v41 = vld [vmem:[%s984_s6 + $0x28] sm:$0xff]   ;;  %v721_v42 = vld [vmem:[%s984_s6 + $0x30] sm:$0xff]  }
   0xc   :  { %267 = vmatpush1.bf16.msra.mxu1 %v699_v11  ;;  %v722_v43 = vld [vmem:[%s984_s6 + $0x38] sm:$0xff]   ;;  %v723_v44 = vld [vmem:[%s986_s8] sm:$0xff]   ;;  %v724_v45 = vld [vmem:[%s986_s8 + $0x8] sm:$0xff]  }
   0xd   :  { %268 = vmatprep.subr.bf16.mxu1 %v700_v12  ;;  %v725_v46 = vld [vmem:[%s986_s8 + $0x10] sm:$0xff]   ;;  %v726_v47 = vld [vmem:[%s986_s8 + $0x18] sm:$0xff]   ;;  %v727_v48 = vld [vmem:[%s986_s8 + $0x20] sm:$0xff]  }
   0xe   :  { %627 = vmatpush3.bf16.msra.mxu0 %v686_v6  ;;  %v728_v49 = vld [vmem:[%s986_s8 + $0x28] sm:$0xff]   ;;  %v170_v53 = vld [vmem:[%s987_s5] sm:$0x3]  ;;  %v729_v7 = vld [vmem:[%s986_s8 + $0x30] sm:$0xff]  }
   0xf   :  { %628 = vmatprep.subr.bf16.mxu0 %v733_v0  ;;  %v175_v55 = vrot.slane %v170_v53, %v174_v52  ;;  %v179_v56 = vrot.slane %v170_v53, %v178_v54  ;;  %v303_v2 = vld [vmem:[%s989_s1] sm:$0xff]  ;;  %v730_v8 = vld [vmem:[%s986_s8 + $0x38] sm:$0xff]  }
  0x10   :  { %269 = vmatpush1.bf16.msra.mxu1 %v702_v14  ;;  %v575_v9 = vld [vmem:[%s991_s7] ss:$0 sm:$0xff] }
  0x11   :  { %270 = vmatprep.subr.bf16.mxu1 %v703_v15 }
  0x12   :  { %629 = vmatpush3.bf16.msra.mxu0 %v687_v10 }
  0x13   :  { %630 = vmatprep.subr.bf16.mxu0 %v733_v0 }
  0x14   :  { %271 = vmatpush1.bf16.msra.mxu1 %v705_v17 }
  0x15   :  { %272 = vmatprep.subr.bf16.mxu1 %v706_v18 }
  0x16   :  { %631 = vmatpush3.bf16.msra.mxu0 %v688_v13 }
  0x17   :  { %632 = vmatprep.subr.bf16.mxu0 %v733_v0 }
  0x18   :  { %273 = vmatpush1.bf16.msra.mxu1 %v708_v21 }
  0x19   :  { %274 = vmatprep.subr.bf16.mxu1 %v709_v23 }
  0x1a   :  { %633 = vmatpush3.bf16.msra.mxu0 %v689_v16 }
  0x1b   :  { %634 = vmatprep.subr.bf16.mxu0 %v733_v0 }
  0x1c   :  { %275 = vmatpush1.bf16.msra.mxu1 %v711_v24 }
  0x1d   :  { %276 = vmatprep.subr.bf16.mxu1 %v712_v25 }
  0x1e   :  { %635 = vmatpush3.bf16.msra.mxu0 %v690_v19 }
  0x1f   :  { %640 = vmatprep.subr.bf16.mxu0 %v733_v0 }
  0x20   :  { %277 = vmatpush1.bf16.msra.mxu1 %v714_v26 }
  0x21   :  { %637 = vmatmul.mubr.bf16.vlgmr.msra.gmra.mrb[0].mxu0 %v40_v22  ;;  %660 = vmatprep.subr.bf16.mxu1 %v733_v0 }
  0x22   :  { %656 = vmatprep.mubr.msk.bf16.mxu0 %vm734_vm0, %v733_v0  ;;  %641 = vmatpush3.bf16.msra.mxu0 %v715_v28 }
  0x23   :  { %642 = vmatprep.subr.bf16.mxu0 %v733_v0 }
  0x26   :  { %643 = vmatpush3.bf16.msra.mxu0 %v716_v29 }
  0x27   :  { %644 = vmatprep.subr.bf16.mxu0 %v733_v0 }
  0x2a   :  { %645 = vmatpush3.bf16.msra.mxu0 %v717_v38 }
  0x2b   :  { %646 = vmatprep.subr.bf16.mxu0 %v733_v0 }
  0x2e   :  { %647 = vmatpush3.bf16.msra.mxu0 %v718_v39 }
  0x2f   :  { %648 = vmatprep.subr.bf16.mxu0 %v733_v0 }
  0x32   :  { %649 = vmatpush3.bf16.msra.mxu0 %v719_v40 }
  0x33   :  { %650 = vmatprep.subr.bf16.mxu0 %v733_v0 }
  0x36   :  { %651 = vmatpush3.bf16.msra.mxu0 %v720_v41 }
  0x37   :  { %652 = vmatprep.subr.bf16.mxu0 %v733_v0 }
  0x3a   :  { %653 = vmatpush3.bf16.msra.mxu0 %v721_v42 }
  0x3b   :  { %654 = vmatprep.subr.bf16.mxu0 %v733_v0 }
  0x3e   :  { %655 = vmatpush3.bf16.msra.mxu0 %v722_v43 }
  0xf4   :  { %v146_v31 = vpop.f32.mrb[0].mxu0 }
  0xf5   :  { %v147_v32 = vadd.f32 %v550_v30, %v146_v31  ;;  %v638_v33 = vpop.f32.mrb[1].mxu0 }
  0xf6   :  { %v149_v34 = vpop.f32.mrb[2].mxu0 }
  0xf7   :  { %v152_v35 = vmax.f32 %v147_v32, 0.0  ;;  %v639_v36 = vpop.f32.mrb[3].mxu0 }
  0xf9   :  { %v153_v37 = vpack.c.bf16 %v152_v35, %v152_v35 }
  0xfb   :  { %295 = vmatmul.mubr.bf16.vlgmr.msra.gmra.mrb[0].mxu1 %v153_v37 }
  0xfc   :  { %676 = vmatprep.mubr.msk.bf16.mxu1 %vm734_vm0, %v733_v0  ;;  %661 = vmatpush3.bf16.msra.mxu1 %v723_v44 }
  0xfd   :  { %662 = vmatprep.subr.bf16.mxu1 %v733_v0 }
 0x100   :  { %663 = vmatpush3.bf16.msra.mxu1 %v724_v45 }
 0x101   :  { %664 = vmatprep.subr.bf16.mxu1 %v733_v0 }
 0x104   :  { %665 = vmatpush3.bf16.msra.mxu1 %v725_v46 }
 0x105   :  { %666 = vmatprep.subr.bf16.mxu1 %v733_v0 }
 0x108   :  { %667 = vmatpush3.bf16.msra.mxu1 %v726_v47 }
 0x109   :  { %668 = vmatprep.subr.bf16.mxu1 %v733_v0 }
 0x10c   :  { %669 = vmatpush3.bf16.msra.mxu1 %v727_v48 }
 0x10d   :  { %670 = vmatprep.subr.bf16.mxu1 %v733_v0 }
 0x110   :  { %671 = vmatpush3.bf16.msra.mxu1 %v728_v49 }
 0x111   :  { %672 = vmatprep.subr.bf16.mxu1 %v733_v0 }
 0x114   :  { %673 = vmatpush3.bf16.msra.mxu1 %v729_v7 }
 0x115   :  { %674 = vmatprep.subr.bf16.mxu1 %v733_v0  ;;  %v584_v0 = vld [vmem:[%s992_s9] ss:$0 sm:$0xff] }
 0x118   :  { %675 = vmatpush3.bf16.msra.mxu1 %v730_v8 }
 0x1ce   :  { %v296_v57 = vpop.f32.mrb[0].mxu1 }
 0x1cf   :  { %v297_v58 = vadd.f32 %v296_v57, %v175_v55  ;;  %v298_v59 = vpop.f32.mrb[1].mxu1 }
 0x1d0   :  { %v299_v60 = vadd.f32 %v298_v59, %v179_v56  ;;  %v300_v61 = vpop.f32.mrb[2].mxu1 }
 0x1d1   :  { %535 = vst [vmem:[%s988_s11] sm:$0xff] %v297_v58  ;;  %v301_v62 = vpop.f32.mrb[3].mxu1 }
 0x1d2   :  { %v304_v63 = vmul.f32 0.5, %v299_v60  ;;  %536 = vst [vmem:[%s988_s11 + $0x8] sm:$0xff] %v299_v60 }
 0x1d4   :  { %v305_v1 = vmul.f32 1.442695, %v304_v63 }
 0x1d6   :  { %731 = vpow2.f32 %v305_v1 }
 0x1e0   :  { %v732_v3 = vpop.eup %731 }
 0x1e1   :  { %v307_v4 = vmul.f32 %v732_v3, %v303_v2 }
 0x1e3   :  { %v308_v5 = vadd.f32 %v307_v4, %v297_v58 }
 0x1e5   :  { %v309_v6 = vpack.c.bf16 %v308_v5, %v308_v5  ;;  %537 = vst [vmem:[%s990_s12] sm:$0xff] %v308_v5 }
 0x1e7   :  { %657 = vmatmul.mubr.bf16.vlgmr.msra.gmra.mrb[4].mxu0 %v309_v6 }
 0x2ba   :  { %v415_v10 = vpop.f32.mrb[4].mxu0 }
 0x2bb   :  { %v416_v11 = vadd.f32 %v575_v9, %v415_v10  ;;  %v658_v12 = vpop.f32.mrb[5].mxu0 }
 0x2bc   :  { %v418_v13 = vpop.f32.mrb[6].mxu0 }
 0x2bd   :  { %v421_v14 = vmax.f32 %v416_v11, 0.0  ;;  %v659_v15 = vpop.f32.mrb[7].mxu0 }
 0x2bf   :  { %v422_v16 = vpack.c.bf16 %v421_v14, %v421_v14 }
 0x2c1   :  { %677 = vmatmul.mubr.bf16.vlgmr.msra.gmra.mrb[4].mxu1 %v422_v16 }
 0x394   :  { %v528_v17 = vpop.f32.mrb[4].mxu1 }
 0x395   :  { %v529_v18 = vadd.f32 %v584_v0, %v528_v17  ;;  %v678_v19 = vpop.f32.mrb[5].mxu1 }
 0x396   :  { %v531_v20 = vpop.f32.mrb[6].mxu1 }
 0x397   :  { %534 = vst [vmem:[%s993_s10] sm:$0xff] %v529_v18  ;;  %v679_v21 = vpop.f32.mrb[7].mxu1 }

</bundles_post_ra>
